<compile_context>
chip_gen: v7x
topology: tpu7x:2x2x1
jax: 0.10.0
libtpu: 0.0.40
codegen_flags: <defaults>
</compile_context>

<pallas_src>
import functools
from typing import NamedTuple, Optional

import jax
import jax.numpy as jnp
from jax.experimental import pallas as pl
from jax.experimental.pallas import tpu as pltpu

_LN_EPS = 1e-6
_MiB = 1024 * 1024


def _round_up(n, m):
    return ((n + m - 1) // m) * m


def _device_vmem_and_kind():
    """Best-effort (device_kind, per-TensorCore VMEM bytes) with safe fallbacks."""
    kind = ""
    try:
        kind = jax.devices()[0].device_kind.lower()
    except Exception:
        pass
    vmem = None
    try:
        vmem = int(pltpu.get_tpu_info().vmem_capacity_bytes)
        if vmem <= 0:
            vmem = None
    except Exception:
        vmem = None
    if vmem is None:
        if "v7" in kind:
            vmem = 64 * _MiB          # v7x: 64 MiB per TensorCore
        elif "v4" in kind or "v5" in kind or "v6" in kind:
            vmem = 128 * _MiB         # v4 / v5e / v6e: 128 MiB
        else:
            vmem = 64 * _MiB          # unknown: be conservative
    return kind, vmem


def _vmem_est(row_tile, k_tile, d_in_pad, itemsize):
    """Per-TensorCore VMEM estimate.

    Note (v7x): the row grid axis is sharded across the 2 TensorCores, but
    every buffer below is replicated per TC, so this estimate is already
    per-TC and is compared against the per-TC budget.
    """
    w_bytes = 2 * 2 * d_in_pad * k_tile * itemsize      # W1/W2 slabs, double-buffered
    xo_bytes = 2 * 2 * row_tile * d_in_pad * itemsize   # x / out tiles, double-buffered
    acc_bytes = row_tile * d_in_pad * 4                 # f32 accumulator scratch
    h_bytes = 2 * row_tile * k_tile * 4                 # f32 hidden intermediate (+copies)
    bias_bytes = 2 * (k_tile + 3 * d_in_pad) * 4
    return w_bytes + xo_bytes + acc_bytes + h_bytes + bias_bytes


# --------------------------------------------------------------------------
# Kernels
# --------------------------------------------------------------------------
def _ln_epilogue(y, g, b, d_in, d_in_pad, eps, out_dtype):
    """LayerNorm over the true d_in features of a (rows, d_in_pad) f32 tile."""
    inv_n = 1.0 / d_in
    mean = jnp.sum(y, axis=-1, keepdims=True) * inv_n     # padded lanes of y are 0
    cent = y - mean
    if d_in == d_in_pad:
        var = jnp.sum(cent * cent, axis=-1, keepdims=True) * inv_n
    else:
        lane = jax.lax.broadcasted_iota(jnp.int32, y.shape, 1)
        cent_m = jnp.where(lane < d_in, cent, 0.0)
        var = jnp.sum(cent_m * cent_m, axis=-1, keepdims=True) * inv_n
    out = cent * jax.lax.rsqrt(var + eps) * g + b
    return out.astype(out_dtype)


def _ffn_kernel_single(x_ref, w1t_ref, b1_ref, w2t_ref, b2_ref, g_ref, beta_ref,
                       o_ref, *, d_in, d_in_pad, eps):
    """Grid = (row tiles,). Whole hidden dim resident -> no accumulator scratch."""
    x = x_ref[...]
    h = jnp.dot(x, w1t_ref[...], preferred_element_type=jnp.float32)
    h = jnp.maximum(h + b1_ref[...], 0.0)
    y = jnp.dot(h.astype(x.dtype), w2t_ref[...], preferred_element_type=jnp.float32)
    y = y + b2_ref[...] + x.astype(jnp.float32)
    o_ref[...] = _ln_epilogue(y, g_ref[...], beta_ref[...], d_in, d_in_pad, eps,
                              o_ref.dtype)


def _ffn_kernel_multi(x_ref, w1t_ref, b1_ref, w2t_ref, b2_ref, g_ref, beta_ref,
                      o_ref, acc_ref, *, d_in, d_in_pad, eps):
    """Grid = (row tiles, hidden-dim K slabs). f32 VMEM accumulator."""
    k = pl.program_id(1)

    x = x_ref[...]
    h = jnp.dot(x, w1t_ref[...], preferred_element_type=jnp.float32)
    h = jnp.maximum(h + b1_ref[...], 0.0)
    contrib = jnp.dot(h.astype(x.dtype), w2t_ref[...],
                      preferred_element_type=jnp.float32)

    # No zero-init round trip: first K step writes, later steps accumulate.
    @pl.when(k == 0)
    def _():
        acc_ref[...] = contrib

    @pl.when(k != 0)
    def _():
        acc_ref[...] += contrib

    @pl.when(k == pl.num_programs(1) - 1)
    def _():
        y = acc_ref[...] + b2_ref[...] + x.astype(jnp.float32)
        o_ref[...] = _ln_epilogue(y, g_ref[...], beta_ref[...], d_in, d_in_pad,
                                  eps, o_ref.dtype)


# --------------------------------------------------------------------------
# Parameter prep (one-time, at load) + forward wrapper
# --------------------------------------------------------------------------
class FFNParams(NamedTuple):
    w1t: jax.Array      # [d_in_pad, d_hid_pad], compute dtype
    b1: jax.Array       # [1, d_hid_pad], f32
    w2t: jax.Array      # [d_hid_pad, d_in_pad], compute dtype
    b2: jax.Array       # [1, d_in_pad], f32
    gamma: jax.Array    # [1, d_in_pad], f32
    beta: jax.Array     # [1, d_in_pad], f32
    d_in: int
    d_hid: int
    d_in_pad: int
    d_hid_pad: int
    k_tile: int
    sublane: int
    vmem_budget: int
    vmem_limit_cap: int
    base_row_tile: int


def prepare_ffn_params(w1, b1, w2, b2, gamma, beta, *,
                       compute_dtype: Optional[jnp.dtype] = None,
                       k_tile: Optional[int] = None) -> FFNParams:
    """One-time prep: cast / transpose / pad weights, pick K tiling + budgets.

    w1: [d_hid, d_in]  (torch w_1.weight)   b1: [d_hid]
    w2: [d_in, d_hid]  (torch w_2.weight)   b2, gamma, beta: [d_in]

    compute_dtype: MXU operand dtype (default: w1.dtype). Passing bf16 for f32
    weights is a throughput/accuracy trade-off, not a drop-in.
    """
    d_hid, d_in = w1.shape
    assert w2.shape == (d_in, d_hid)
    if compute_dtype is None:
        compute_dtype = w1.dtype
    compute_dtype = jnp.dtype(compute_dtype)
    itemsize = compute_dtype.itemsize

    kind, vmem_cap = _device_vmem_and_kind()

    # Generation-aware per-TC VMEM budgeting:
    #   128-MiB parts (v5e/v6e): ~96 MiB budget, 100 MiB scoped limit.
    #   v7x (64 MiB per TC):      40 MiB budget,  48 MiB scoped limit.
    vmem_budget = max(24 * _MiB, min(vmem_cap * 3 // 4, vmem_cap - 24 * _MiB))
    vmem_limit_cap = max(32 * _MiB, min(vmem_cap - 16 * _MiB, 100 * _MiB))

    # Packed-sublane multiple of the compute dtype (f32:8, bf16:16, int8/fp8:32).
    sublane = {4: 8, 2: 16, 1: 32}.get(itemsize, 8)
    # Full 256-wide MXU passes for 16-bit operands on v6e/v7x; 128 elsewhere.
    lane_align = 256 if (itemsize == 2 and "v5" not in kind) else 128

    d_in_pad = _round_up(d_in, lane_align)
    base_row_tile = 128 if "v5" in kind else 256

    if k_tile is None:
        # Cap the K slab so the f32 hidden intermediate stays ~<= 1 MiB / tile.
        k_tile = min(_round_up(d_hid, lane_align), 1024)
        while (_vmem_est(base_row_tile, k_tile, d_in_pad, itemsize) > vmem_budget
               and k_tile > lane_align):
            k_tile = max(lane_align, _round_up(k_tile // 2, lane_align))
    else:
        k_tile = _round_up(k_tile, 128)
    d_hid_pad = _round_up(d_hid, k_tile)

    def pad2(a, shp):
        a = jnp.asarray(a).astype(compute_dtype)
        if a.shape != shp:
            a = jnp.pad(a, ((0, shp[0] - a.shape[0]), (0, shp[1] - a.shape[1])))
        return a

    def pad_row(v, n):
        v = jnp.asarray(v).astype(jnp.float32)
        if v.shape[0] != n:
            v = jnp.pad(v, (0, n - v.shape[0]))
        return v.reshape(1, n)

    return FFNParams(
        w1t=pad2(jnp.asarray(w1).T, (d_in_pad, d_hid_pad)),
        b1=pad_row(b1, d_hid_pad),
        w2t=pad2(jnp.asarray(w2).T, (d_hid_pad, d_in_pad)),
        b2=pad_row(b2, d_in_pad),
        gamma=pad_row(gamma, d_in_pad),
        beta=pad_row(beta, d_in_pad),
        d_in=d_in, d_hid=d_hid, d_in_pad=d_in_pad, d_hid_pad=d_hid_pad,
        k_tile=k_tile, sublane=sublane,
        vmem_budget=int(vmem_budget), vmem_limit_cap=int(vmem_limit_cap),
        base_row_tile=base_row_tile,
    )


def positionwise_feed_forward(x, params: FFNParams, *, row_tile=None):
    """Fused FFN + residual + LayerNorm (eval mode; dropout is identity).

    x: [bs, seq_l, d_in] -> [bs, seq_l, d_in]
    """
    bs, seq_l, d_in = x.shape
    assert d_in == params.d_in
    rows = bs * seq_l
    out_dtype = x.dtype
    compute_dtype = params.w1t.dtype
    itemsize = jnp.dtype(compute_dtype).itemsize
    d_in_pad, d_hid_pad, k_tile = params.d_in_pad, params.d_hid_pad, params.k_tile
    sublane = params.sublane

    # ---- row tiling ---------------------------------------------------------
    if row_tile is None:
        row_tile = params.base_row_tile
        # On 128-MiB-VMEM parts, grow the row tile for large row counts:
        # halves per-row-tile weight re-streaming when K is tiled.
        if (params.vmem_budget >= 72 * _MiB and rows >= 512
                and _vmem_est(512, k_tile, d_in_pad, itemsize) <= params.vmem_budget):
            row_tile = 512
    row_tile = min(row_tile, _round_up(rows, sublane))
    row_tile = max(sublane, _round_up(row_tile, sublane))
    # Fallback: if the K-slab choice alone cannot meet the budget, shrink rows.
    while (_vmem_est(row_tile, k_tile, d_in_pad, itemsize) > params.vmem_budget
           and row_tile > sublane):
        row_tile = max(sublane, _round_up(row_tile // 2, sublane))

    rows_pad = _round_up(rows, row_tile)
    num_row_tiles = rows_pad // row_tile
    num_k = d_hid_pad // k_tile

    # ---- activation prep (pad only when actually needed) ---------------------
    x2d = x.reshape(rows, d_in)
    if x2d.dtype != compute_dtype:
        x2d = x2d.astype(compute_dtype)
    if rows_pad != rows or d_in_pad != d_in:
        x2d = jnp.pad(x2d, ((0, rows_pad - rows), (0, d_in_pad - d_in)))

    vmem_need = _vmem_est(row_tile, k_tile, d_in_pad, itemsize)
    vmem_limit = int(min(params.vmem_limit_cap, max(32 * _MiB, 2 * vmem_need)))

    w_bytes = (params.w1t.size + params.w2t.size) * itemsize
    flops = 4.0 * rows_pad * d_in_pad * d_hid_pad + 10.0 * rows_pad * d_in_pad
    bytes_accessed = (rows_pad * d_in_pad * itemsize                          # x read
                      + rows_pad * d_in_pad * jnp.dtype(out_dtype).itemsize   # out write
                      + num_row_tiles * w_bytes                               # weight (re)streaming
                      + (params.b1.size + 3 * params.b2.size) * 4)            # biases
    cost = pl.CostEstimate(flops=int(flops), transcendentals=int(rows_pad),
                           bytes_accessed=int(bytes_accessed))

    if num_k == 1:
        kernel = functools.partial(_ffn_kernel_single, d_in=d_in,
                                   d_in_pad=d_in_pad, eps=_LN_EPS)
        grid_spec = pltpu.PrefetchScalarGridSpec(
            num_scalar_prefetch=0,
            grid=(num_row_tiles,),
            in_specs=[
                pl.BlockSpec((row_tile, d_in_pad), lambda i: (i, 0)),    # x rows
                pl.BlockSpec((d_in_pad, d_hid_pad), lambda i: (0, 0)),   # W1^T (resident)
                pl.BlockSpec((1, d_hid_pad), lambda i: (0, 0)),          # b1 (resident)
                pl.BlockSpec((d_hid_pad, d_in_pad), lambda i: (0, 0)),   # W2^T (resident)
                pl.BlockSpec((1, d_in_pad), lambda i: (0, 0)),           # b2
                pl.BlockSpec((1, d_in_pad), lambda i: (0, 0)),           # gamma
                pl.BlockSpec((1, d_in_pad), lambda i: (0, 0)),           # beta
            ],
            out_specs=pl.BlockSpec((row_tile, d_in_pad), lambda i: (i, 0)),
        )
        dim_sem = ("parallel",)
    else:
        kernel = functools.partial(_ffn_kernel_multi, d_in=d_in,
                                   d_in_pad=d_in_pad, eps=_LN_EPS)
        grid_spec = pltpu.PrefetchScalarGridSpec(
            num_scalar_prefetch=0,
            grid=(num_row_tiles, num_k),
            in_specs=[
                pl.BlockSpec((row_tile, d_in_pad), lambda i, k: (i, 0)),  # x rows
                pl.BlockSpec((d_in_pad, k_tile), lambda i, k: (0, k)),    # W1^T K-slab
                pl.BlockSpec((1, k_tile), lambda i, k: (0, k)),           # b1 K-slab
                pl.BlockSpec((k_tile, d_in_pad), lambda i, k: (k, 0)),    # W2^T K-slab
                pl.BlockSpec((1, d_in_pad), lambda i, k: (0, 0)),         # b2 (resident)
                pl.BlockSpec((1, d_in_pad), lambda i, k: (0, 0)),         # gamma (resident)
                pl.BlockSpec((1, d_in_pad), lambda i, k: (0, 0)),         # beta (resident)
            ],
            out_specs=pl.BlockSpec((row_tile, d_in_pad), lambda i, k: (i, 0)),
            scratch_shapes=[pltpu.VMEM((row_tile, d_in_pad), jnp.float32)],
        )
        dim_sem = ("parallel", "arbitrary")

    out2d = pl.pallas_call(
        kernel,
        out_shape=jax.ShapeDtypeStruct((rows_pad, d_in_pad), out_dtype),
        grid_spec=grid_spec,
        compiler_params=pltpu.CompilerParams(
            dimension_semantics=dim_sem,
            vmem_limit_bytes=vmem_limit,
        ),
        cost_estimate=cost,
    )(x2d, params.w1t, params.b1, params.w2t, params.b2, params.gamma, params.beta)

    if rows_pad != rows or d_in_pad != d_in:
        out2d = out2d[:rows, :d_in]
    return out2d.reshape(bs, seq_l, d_in)


# --------------------------------------------------------------------------
# Reference + tests
# --------------------------------------------------------------------------
def _reference(x, w1, b1, w2, b2, gamma, beta):
    """Pure-JAX reference mirroring the PyTorch forward (eval mode)."""
    residual = x
    h = jnp.maximum(x @ w1.T + b1, 0.0)
    y = h @ w2.T + b2 + residual
    mean = jnp.mean(y, axis=-1, keepdims=True)
    var = jnp.mean((y - mean) ** 2, axis=-1, keepdims=True)
    return (y - mean) / jnp.sqrt(var + 1e-6) * gamma + beta


if __name__ == "__main__":
    bs, seq_l, d_in, d_hid = 2, 8, 32, 64

    key = jax.random.PRNGKey(0)
    kx, kw1, kb1, kw2, kb2, kw1b, kb1b, kw2b, kb2b = jax.random.split(key, 9)

    x = jax.random.normal(kx, (bs, seq_l, d_in), dtype=jnp.float32)

    # Parameter init with nn.Linear / nn.LayerNorm shapes.
    bound1 = 1.0 / (d_in ** 0.5)
    bound2 = 1.0 / (d_hid ** 0.5)
    w1 = jax.random.uniform(kw1, (d_hid, d_in), minval=-bound1, maxval=bound1)
    b1 = jax.random.uniform(kb1, (d_hid,), minval=-bound1, maxval=bound1)
    w2 = jax.random.uniform(kw2, (d_in, d_hid), minval=-bound2, maxval=bound2)
    b2 = jax.random.uniform(kb2, (d_in,), minval=-bound2, maxval=bound2)
    gamma = jnp.ones((d_in,), jnp.float32)
    beta = jnp.zeros((d_in,), jnp.float32)

    # --- test 1: default path (single hidden slab -> no accumulator scratch) --
    params = prepare_ffn_params(w1, b1, w2, b2, gamma, beta)   # one-time prep
    out = positionwise_feed_forward(x, params)
    out = jax.block_until_ready(out)
    ref = _reference(x, w1, b1, w2, b2, gamma, beta)
    assert out.shape == (bs, seq_l, d_in)
    assert jnp.allclose(out, ref, atol=1e-4, rtol=1e-4), "mismatch (single-slab path)"

    # --- test 2: exercise the K-tiled accumulator path + row tiling -----------
    d_hid_big = 256
    bound2b = 1.0 / (d_hid_big ** 0.5)
    w1b = jax.random.uniform(kw1b, (d_hid_big, d_in), minval=-bound1, maxval=bound1)
    b1b = jax.random.uniform(kb1b, (d_hid_big,), minval=-bound1, maxval=bound1)
    w2b = jax.random.uniform(kw2b, (d_in, d_hid_big), minval=-bound2b, maxval=bound2b)
    b2b = jax.random.uniform(kb2b, (d_in,), minval=-bound2b, maxval=bound2b)

    params_b = prepare_ffn_params(w1b, b1b, w2b, b2b, gamma, beta, k_tile=128)
    out2 = positionwise_feed_forward(x, params_b, row_tile=8)  # 2 row tiles x 2 K slabs
    out2 = jax.block_until_ready(out2)
    ref2 = _reference(x, w1b, b1b, w2b, b2b, gamma, beta)
    assert jnp.allclose(out2, ref2, atol=1e-4, rtol=1e-4), "mismatch (K-tiled path)"

    # TODO(synk): dropout(p=0.1) in training mode would need pltpu.prng_* masks;
    # eval-mode forward (identity dropout) is what is implemented here.
    print("KERNEL_OK")
</pallas_src>

<mosaic_0001>
module attributes {stable_mosaic.version = 11 : i64} {
  func.func @_ffn_kernel_single(%arg0: i32, %arg1: memref<16x128xf32, #tpu.memory_space<vmem>>, %arg2: memref<128x128xf32, #tpu.memory_space<vmem>>, %arg3: memref<1x128xf32, #tpu.memory_space<vmem>>, %arg4: memref<128x128xf32, #tpu.memory_space<vmem>>, %arg5: memref<1x128xf32, #tpu.memory_space<vmem>>, %arg6: memref<1x128xf32, #tpu.memory_space<vmem>>, %arg7: memref<1x128xf32, #tpu.memory_space<vmem>>, %arg8: memref<16x128xf32, #tpu.memory_space<vmem>>) attributes {dimension_semantics = [#tpu.dimension_semantics<parallel>], iteration_bounds = array<i64: 1>, scalar_prefetch = 0 : i64, scratch_operands = 0 : i64, tpu.core_type = #tpu.core_type<tc>, window_params = [{transform_indices = @transform_0, window_bounds = array<i64: 16, 128>}, {pipeline_mode = #tpu.pipeline_mode<synchronous>, transform_indices = @transform_1, window_bounds = array<i64: 128, 128>}, {pipeline_mode = #tpu.pipeline_mode<synchronous>, transform_indices = @transform_2, window_bounds = array<i64: 1, 128>}, {pipeline_mode = #tpu.pipeline_mode<synchronous>, transform_indices = @transform_3, window_bounds = array<i64: 128, 128>}, {pipeline_mode = #tpu.pipeline_mode<synchronous>, transform_indices = @transform_4, window_bounds = array<i64: 1, 128>}, {pipeline_mode = #tpu.pipeline_mode<synchronous>, transform_indices = @transform_5, window_bounds = array<i64: 1, 128>}, {pipeline_mode = #tpu.pipeline_mode<synchronous>, transform_indices = @transform_6, window_bounds = array<i64: 1, 128>}, {transform_indices = @transform_7, window_bounds = array<i64: 16, 128>}]} {
    %c0 = arith.constant 0 : index
    %c0_0 = arith.constant 0 : index
    %0 = vector.load %arg1[%c0, %c0_0] : memref<16x128xf32, #tpu.memory_space<vmem>>, vector<16x128xf32>
    %c0_1 = arith.constant 0 : index
    %c0_2 = arith.constant 0 : index
    %1 = vector.load %arg2[%c0_1, %c0_2] : memref<128x128xf32, #tpu.memory_space<vmem>>, vector<128x128xf32>
    %cst = arith.constant dense<0.000000e+00> : vector<16x128xf32>
    %2 = tpu.matmul %0, %1, %cst {dimension_numbers = #tpu.dot_dimension_numbers<[1], [0], [0], [1], [0, 0, 1, 1], [], []>} : vector<16x128xf32>, vector<128x128xf32>, vector<16x128xf32> -> vector<16x128xf32>
    %c0_3 = arith.constant 0 : index
    %c0_4 = arith.constant 0 : index
    %3 = vector.load %arg3[%c0_3, %c0_4] : memref<1x128xf32, #tpu.memory_space<vmem>>, vector<1x128xf32>
    %4 = vector.broadcast %3 : vector<1x128xf32> to vector<16x128xf32>
    %5 = arith.addf %2, %4 : vector<16x128xf32>
    %cst_5 = arith.constant 0.000000e+00 : f32
    %6 = vector.broadcast %cst_5 : f32 to vector<16x128xf32>
    %7 = arith.maximumf %5, %6 : vector<16x128xf32>
    %c0_6 = arith.constant 0 : index
    %c0_7 = arith.constant 0 : index
    %8 = vector.load %arg4[%c0_6, %c0_7] : memref<128x128xf32, #tpu.memory_space<vmem>>, vector<128x128xf32>
    %cst_8 = arith.constant dense<0.000000e+00> : vector<16x128xf32>
    %9 = tpu.matmul %7, %8, %cst_8 {dimension_numbers = #tpu.dot_dimension_numbers<[1], [0], [0], [1], [0, 0, 1, 1], [], []>} : vector<16x128xf32>, vector<128x128xf32>, vector<16x128xf32> -> vector<16x128xf32>
    %c0_9 = arith.constant 0 : index
    %c0_10 = arith.constant 0 : index
    %10 = vector.load %arg5[%c0_9, %c0_10] : memref<1x128xf32, #tpu.memory_space<vmem>>, vector<1x128xf32>
    %11 = vector.broadcast %10 : vector<1x128xf32> to vector<16x128xf32>
    %12 = arith.addf %9, %11 : vector<16x128xf32>
    %13 = arith.addf %12, %0 : vector<16x128xf32>
    %c0_11 = arith.constant 0 : index
    %c0_12 = arith.constant 0 : index
    %14 = vector.load %arg6[%c0_11, %c0_12] : memref<1x128xf32, #tpu.memory_space<vmem>>, vector<1x128xf32>
    %c0_13 = arith.constant 0 : index
    %c0_14 = arith.constant 0 : index
    %15 = vector.load %arg7[%c0_13, %c0_14] : memref<1x128xf32, #tpu.memory_space<vmem>>, vector<1x128xf32>
    %cst_15 = arith.constant dense<0.000000e+00> : vector<16xf32>
    %16 = vector.multi_reduction <add>, %13, %cst_15 [1] : vector<16x128xf32> to vector<16xf32>
    %17 = vector.shape_cast %16 : vector<16xf32> to vector<16x1xf32>
    %cst_16 = arith.constant 3.125000e-02 : f32
    %18 = vector.broadcast %cst_16 : f32 to vector<16x1xf32>
    %19 = arith.mulf %17, %18 : vector<16x1xf32>
    %20 = vector.broadcast %19 : vector<16x1xf32> to vector<16x128xf32>
    %21 = arith.subf %13, %20 : vector<16x128xf32>
    %22 = tpu.iota {dimensions = array<i32: 1>} : vector<16x128xi32>
    %c32_i32 = arith.constant 32 : i32
    %23 = vector.broadcast %c32_i32 : i32 to vector<16x128xi32>
    %24 = arith.cmpi slt, %22, %23 : vector<16x128xi32>
    %cst_17 = arith.constant 0.000000e+00 : f32
    %25 = vector.broadcast %cst_17 : f32 to vector<16x128xf32>
    %26 = arith.select %24, %21, %25 : vector<16x128xi1>, vector<16x128xf32>
    %27 = arith.mulf %26, %26 : vector<16x128xf32>
    %cst_18 = arith.constant dense<0.000000e+00> : vector<16xf32>
    %28 = vector.multi_reduction <add>, %27, %cst_18 [1] : vector<16x128xf32> to vector<16xf32>
    %29 = vector.shape_cast %28 : vector<16xf32> to vector<16x1xf32>
    %cst_19 = arith.constant 3.125000e-02 : f32
    %30 = vector.broadcast %cst_19 : f32 to vector<16x1xf32>
    %31 = arith.mulf %29, %30 : vector<16x1xf32>
    %cst_20 = arith.constant 9.99999997E-7 : f32
    %32 = vector.broadcast %cst_20 : f32 to vector<16x1xf32>
    %33 = arith.addf %31, %32 : vector<16x1xf32>
    %34 = math.rsqrt %33 : vector<16x1xf32>
    %35 = vector.broadcast %34 : vector<16x1xf32> to vector<16x128xf32>
    %36 = arith.mulf %21, %35 : vector<16x128xf32>
    %37 = vector.broadcast %14 : vector<1x128xf32> to vector<16x128xf32>
    %38 = arith.mulf %36, %37 : vector<16x128xf32>
    %39 = vector.broadcast %15 : vector<1x128xf32> to vector<16x128xf32>
    %40 = arith.addf %38, %39 : vector<16x128xf32>
    %c0_21 = arith.constant 0 : index
    %c0_22 = arith.constant 0 : index
    %41 = vector.load %arg8[%c0_21, %c0_22] : memref<16x128xf32, #tpu.memory_space<vmem>>, vector<16x128xf32>
    tpu.vector_store %arg8[%c0_21, %c0_22], %40 {strides = array<i32>} : memref<16x128xf32, #tpu.memory_space<vmem>>, vector<16x128xf32>,
    return
  }
  func.func @transform_0(%arg0: i32) -> (i32, i32) {
    %c0_i32 = arith.constant 0 : i32
    %c0_i32_0 = arith.constant 0 : i32
    return %arg0, %c0_i32 : i32, i32
  }
  func.func @transform_1(%arg0: i32) -> (i32, i32) {
    %c0_i32 = arith.constant 0 : i32
    %c0_i32_0 = arith.constant 0 : i32
    %c0_i32_1 = arith.constant 0 : i32
    return %c0_i32, %c0_i32_0 : i32, i32
  }
  func.func @transform_2(%arg0: i32) -> (i32, i32) {
    %c0_i32 = arith.constant 0 : i32
    %c0_i32_0 = arith.constant 0 : i32
    %c0_i32_1 = arith.constant 0 : i32
    return %c0_i32, %c0_i32_0 : i32, i32
  }
  func.func @transform_3(%arg0: i32) -> (i32, i32) {
    %c0_i32 = arith.constant 0 : i32
    %c0_i32_0 = arith.constant 0 : i32
    %c0_i32_1 = arith.constant 0 : i32
    return %c0_i32, %c0_i32_0 : i32, i32
  }
  func.func @transform_4(%arg0: i32) -> (i32, i32) {
    %c0_i32 = arith.constant 0 : i32
    %c0_i32_0 = arith.constant 0 : i32
    %c0_i32_1 = arith.constant 0 : i32
    return %c0_i32, %c0_i32_0 : i32, i32
  }
  func.func @transform_5(%arg0: i32) -> (i32, i32) {
    %c0_i32 = arith.constant 0 : i32
    %c0_i32_0 = arith.constant 0 : i32
    %c0_i32_1 = arith.constant 0 : i32
    return %c0_i32, %c0_i32_0 : i32, i32
  }
  func.func @transform_6(%arg0: i32) -> (i32, i32) {
    %c0_i32 = arith.constant 0 : i32
    %c0_i32_0 = arith.constant 0 : i32
    %c0_i32_1 = arith.constant 0 : i32
    return %c0_i32, %c0_i32_0 : i32, i32
  }
  func.func @transform_7(%arg0: i32) -> (i32, i32) {
    %c0_i32 = arith.constant 0 : i32
    %c0_i32_0 = arith.constant 0 : i32
    return %arg0, %c0_i32 : i32, i32
  }
}

</mosaic_0001>

<bundles_post_ra>
// kernel: tpu_custom_call.1
= control target key start
LH: loop header
LB: loop body
LE: loop exit
PB: predicated region body
PF: predicated region fallthrough
CT: control target
= control target key end

     0   :  { %12 = vsyncpa [#allocation3], 0  ;;  %s742_s0 = inlined_call_operand.hbm [shape: f32[16,128], index: 0, kind: input, shape index: {}]   ;;  %s743_s1 = inlined_call_operand.hbm [shape: f32[128,128], index: 1, kind: input, shape index: {}]   ;;  %s744_s2 = inlined_call_operand.vmem [shape: f32[1,128], index: 2, kind: input, shape index: {}]   ;;  %s745_s3 = inlined_call_operand.hbm [shape: f32[128,128], index: 3, kind: input, shape index: {}]   ;;  %s746_s4 = inlined_call_operand.vmem [shape: f32[1,128], index: 4, kind: input, shape index: {}]   ;;  %s747_s5 = inlined_call_operand.vmem [shape: f32[1,128], index: 5, kind: input, shape index: {}]   ;;  %s748_s6 = inlined_call_operand.vmem [shape: f32[1,128], index: 6, kind: input, shape index: {}]   ;;  %s749_s7 = inlined_call_operand.hbm [shape: f32[16,128], index: 7, kind: output, shape index: {}]  }
   0x1   :  { %13 = vsyncpa [#allocation6], 0 }
   0x2   :  { %14 = vsyncpa [#allocation4], 0  ;;  %s613_s24 = smov [#allocation5]   ;;  %s614_s26 = smov [#allocation2]  }
   0x3   :  { %s32_s25 = sshll.u32 %s613_s24, 4  ;;  %s20_s27 = sshll.u32 %s614_s26, 4  ;;  %s33_s25 = int_to_ptr.vmem [resolvable:$true] %s32_s25  ;;  %s659_s27 = int_to_ptr.vmem [resolvable:$true] %s20_s27 }
   0x4   :  { %s519_s30 = scalar_lea.hbm %s743_s1, 2048 }
   0x5   :  { %p520_p0 = scmp.ne.s32.totalorder %s743_s1, %s519_s30  ;;  %p523_p1 = scmp.lt.u32.totalorder %s519_s30, %s743_s1 }
   0x7   :  { %p525_p2 = pnand %p523_p1, %p520_p0 }
   0x9   :  { %528 = shalt.err (!%p525_p2)
}
   0xa   :  { %s529_s12 = scalar_lea.vmem %s33_s25, 2048  ;;  %p534_p4 = scmp.lt.s32.totalorder %s33_s25, %s33_s25 }
   0xb   :  { %p530_p3 = scmp.ne.s32.totalorder %s33_s25, %s529_s12  ;;  %p535_p5 = scmp.lt.s32.totalorder %s529_s12, %s529_s12 }
   0xd   :  { %p536_p6 = por %p535_p5, %p534_p4 }
   0xf   :  { %p537_p7 = pnand %p536_p6, %p530_p3 }
  0x11   :  { %540 = shalt.err (!%p537_p7)
}
  0x12   :  { %s615_s13 = smov 128   ;;  %s616_s14 = smov 8  }
  0x13   :  { %38 = dma.hbm_to_vmem [thread:$0]  %s743_s1, 2048, %s33_s25, [#allocation6], %s615_s13, %s615_s13, %s616_s14  }
  0x14   :  { %s541_s19 = scalar_lea.hbm %s742_s0, 256 }
  0x15   :  { %p542_p8 = scmp.ne.s32.totalorder %s742_s0, %s541_s19  ;;  %p545_p9 = scmp.lt.u32.totalorder %s541_s19, %s742_s0 }
  0x17   :  { %p547_p10 = pnand %p545_p9, %p542_p8 }
  0x19   :  { %550 = shalt.err (!%p547_p10)
}
  0x1a   :  { %s551_s24 = scalar_lea.vmem %s659_s27, 256  ;;  %p556_p12 = scmp.lt.s32.totalorder %s659_s27, %s659_s27 }
  0x1b   :  { %p552_p11 = scmp.ne.s32.totalorder %s659_s27, %s551_s24  ;;  %p557_p13 = scmp.lt.s32.totalorder %s551_s24, %s551_s24 }
  0x1d   :  { %p558_p0 = por %p557_p13, %p556_p12 }
  0x1f   :  { %p559_p1 = pnand %p558_p0, %p552_p11 }
  0x21   :  { %562 = shalt.err (!%p559_p1)
}
  0x22   :  { %26 = dma.hbm_to_vmem [thread:$0]  %s742_s0, 256, %s659_s27, [#allocation3], %s615_s13, %s615_s13, %s616_s14  }
  0x23   :  { %s617_s26 = smov [#allocation7]   ;;  %s563_s8 = scalar_lea.hbm %s745_s3, 2048 }
  0x24   :  { %s46_s28 = sshll.u32 %s617_s26, 4  ;;  %p564_p2 = scmp.ne.s32.totalorder %s745_s3, %s563_s8  ;;  %s47_s28 = int_to_ptr.vmem [resolvable:$true] %s46_s28 }
  0x25   :  { %p567_p3 = scmp.lt.u32.totalorder %s563_s8, %s745_s3 }
  0x27   :  { %p569_p4 = pnand %p567_p3, %p564_p2 }
  0x29   :  { %572 = shalt.err (!%p569_p4)
}
  0x2a   :  { %s573_s15 = scalar_lea.vmem %s47_s28, 2048  ;;  %p578_p6 = scmp.lt.s32.totalorder %s47_s28, %s47_s28 }
  0x2b   :  { %p574_p5 = scmp.ne.s32.totalorder %s47_s28, %s573_s15  ;;  %p579_p7 = scmp.lt.s32.totalorder %s573_s15, %s573_s15 }
  0x2d   :  { %p580_p8 = por %p579_p7, %p578_p6 }
  0x2f   :  { %p581_p9 = pnand %p580_p8, %p574_p5 }
  0x31   :  { %584 = shalt.err (!%p581_p9)
}
  0x32   :  { %52 = dma.hbm_to_vmem [thread:$0]  %s745_s3, 2048, %s47_s28, [#allocation6], %s615_s13, %s615_s13, %s616_s14  }
  0x33   :  { %607 = dma.done.wait [#allocation3], 256  }
  0x34   :  { %608 = vsyncadd [#allocation3], 4294967040 }
  0x35   :  { %609 = dma.done.wait [#allocation6], 4096  }
  0x36   :  { %610 = vsyncadd [#allocation6], 4294963200  ;;  %v70_v0 = vld [vmem:[#allocation5] sm:$0xff]  ;;  %v71_v1 = vld [vmem:[#allocation5 + $0x8] sm:$0xff]  ;;  %s618_s21 = smov [#allocation8]  }
  0x37   :  { %v72_v2 = vld [vmem:[#allocation5 + $0x10] sm:$0xff]  ;;  %v445_v3 = vpack.c.bf16 %v71_v1, %v70_v0  ;;  %v73_v4 = vld [vmem:[#allocation5 + $0x18] sm:$0xff]  ;;  %v74_v6 = vld [vmem:[#allocation5 + $0x20] sm:$0xff]  ;;  %v280_v0 = vlaneseq  ;;  %s322_s22 = sshll.u32 %s618_s21, 4  ;;  %s323_s22 = int_to_ptr.vmem [resolvable:$true] %s322_s22 }
  0x38   :  { %v449_v5 = vpack.c.bf16 %v73_v4, %v72_v2  ;;  %v75_v7 = vld [vmem:[#allocation5 + $0x28] sm:$0xff]  ;;  %v76_v9 = vld [vmem:[#allocation5 + $0x30] sm:$0xff]  ;;  %v77_v10 = vld [vmem:[#allocation5 + $0x38] sm:$0xff]  ;;  %s585_s23 = scalar_lea.vmem %s323_s22, 256  ;;  %p590_p11 = scmp.lt.s32.totalorder %s323_s22, %s323_s22 }
  0x39   :  { %446 = vmatprep.subr.bf16.mxu0 %v445_v3  ;;  %v453_v8 = vpack.c.bf16 %v75_v7, %v74_v6  ;;  %v711_v11 = vld [vmem:[#allocation2] sm:$0xff]  ;;  %v170_v12 = vld [vmem:[#allocation7] sm:$0xff]  ;;  %v171_v13 = vld [vmem:[#allocation7 + $0x8] sm:$0xff]  ;;  %v457_v20 = vpack.c.bf16 %v77_v10, %v76_v9  ;;  %v281_v1 = vand.u32 127, %v280_v0  ;;  %p586_p10 = scmp.ne.s32.totalorder %s323_s22, %s585_s23  ;;  %p591_p12 = scmp.lt.s32.totalorder %s585_s23, %s585_s23 }
  0x3a   :  { %448 = vmatpush3.bf16.msra.mxu0 %v445_v3  ;;  %407 = vmatprep.mubr.f32.mxu0 %v711_v11  ;;  %v172_v14 = vld [vmem:[#allocation7 + $0x10] sm:$0xff]  ;;  %v477_v15 = vpack.c.bf16 %v171_v13, %v170_v12  ;;  %v173_v16 = vld [vmem:[#allocation7 + $0x18] sm:$0xff]  ;;  %v174_v18 = vld [vmem:[#allocation7 + $0x20] sm:$0xff] }
  0x3b   :  { %450 = vmatprep.subr.bf16.mxu0 %v449_v5  ;;  %v481_v17 = vpack.c.bf16 %v173_v16, %v172_v14  ;;  %v175_v19 = vld [vmem:[#allocation7 + $0x28] sm:$0xff]  ;;  %v78_v21 = vld [vmem:[#allocation5 + $0x40] sm:$0xff]  ;;  %v176_v24 = vld [vmem:[#allocation7 + $0x30] sm:$0xff]  ;;  %vm282_vm0 = vcmp.lt.s32.totalorder %v281_v1, 32  ;;  %p592_p13 = por %p591_p12, %p590_p11 }
  0x3c   :  { %478 = vmatprep.subr.bf16.mxu1 %v477_v15  ;;  %v79_v22 = vld [vmem:[#allocation5 + $0x48] sm:$0xff]  ;;  %v485_v23 = vpack.c.bf16 %v175_v19, %v174_v18  ;;  %v177_v25 = vld [vmem:[#allocation7 + $0x38] sm:$0xff]  ;;  %v80_v27 = vld [vmem:[#allocation5 + $0x50] sm:$0xff] }
  0x3d   :  { %480 = vmatpush3.bf16.msra.mxu1 %v477_v15  ;;  %v461_v26 = vpack.c.bf16 %v79_v22, %v78_v21  ;;  %v81_v28 = vld [vmem:[#allocation5 + $0x58] sm:$0xff]  ;;  %v489_v29 = vpack.c.bf16 %v177_v25, %v176_v24  ;;  %v178_v30 = vld [vmem:[#allocation7 + $0x40] sm:$0xff]  ;;  %v179_v31 = vld [vmem:[#allocation7 + $0x48] sm:$0xff]  ;;  %p593_p0 = pnand %p592_p13, %p586_p10 }
  0x3e   :  { %452 = vmatpush3.bf16.msra.mxu0 %v449_v5  ;;  %482 = vmatprep.subr.bf16.mxu1 %v481_v17  ;;  %v465_v32 = vpack.c.bf16 %v81_v28, %v80_v27  ;;  %v82_v33 = vld [vmem:[#allocation5 + $0x60] sm:$0xff]  ;;  %v83_v34 = vld [vmem:[#allocation5 + $0x68] sm:$0xff]  ;;  %v493_v35 = vpack.c.bf16 %v179_v31, %v178_v30  ;;  %v180_v36 = vld [vmem:[#allocation7 + $0x50] sm:$0xff] }
  0x3f   :  { %454 = vmatprep.subr.bf16.mxu0 %v453_v8  ;;  %v181_v37 = vld [vmem:[#allocation7 + $0x58] sm:$0xff]  ;;  %v469_v38 = vpack.c.bf16 %v83_v34, %v82_v33  ;;  %v84_v39 = vld [vmem:[#allocation5 + $0x70] sm:$0xff]  ;;  %v182_v42 = vld [vmem:[#allocation7 + $0x60] sm:$0xff] }
  0x40   :  { %v85_v40 = vld [vmem:[#allocation5 + $0x78] sm:$0xff]  ;;  %v497_v41 = vpack.c.bf16 %v181_v37, %v180_v36  ;;  %v183_v43 = vld [vmem:[#allocation7 + $0x68] sm:$0xff]  ;;  %v184_v47 = vld [vmem:[#allocation7 + $0x70] sm:$0xff] }
  0x41   :  { %484 = vmatpush3.bf16.msra.mxu1 %v481_v17  ;;  %v473_v44 = vpack.c.bf16 %v85_v40, %v84_v39  ;;  %v501_v45 = vpack.c.bf16 %v183_v43, %v182_v42  ;;  %v69_v46 = vld [vmem:[#allocation2 + $0x8] sm:$0xff]  ;;  %v335_v50 = vld [vmem:[%s744_s2] ss:$0 sm:$0xff] }
  0x42   :  { %456 = vmatpush3.bf16.msra.mxu0 %v453_v8  ;;  %486 = vmatprep.subr.bf16.mxu1 %v485_v23  ;;  %v185_v48 = vld [vmem:[#allocation7 + $0x78] sm:$0xff]  ;;  %v336_v57 = vld [vmem:[%s746_s4] ss:$0 sm:$0xff] }
  0x43   :  { %458 = vmatprep.subr.bf16.mxu0 %v457_v20  ;;  %v505_v49 = vpack.c.bf16 %v185_v48, %v184_v47  ;;  %v337_v19 = vld [vmem:[%s747_s5] ss:$0 sm:$0xff] }
  0x44   :  { %v338_v21 = vld [vmem:[%s748_s6] ss:$0 sm:$0xff] }
  0x45   :  { %488 = vmatpush3.bf16.msra.mxu1 %v485_v23 }
  0x46   :  { %460 = vmatpush3.bf16.msra.mxu0 %v457_v20  ;;  %490 = vmatprep.subr.bf16.mxu1 %v489_v29 }
  0x47   :  { %462 = vmatprep.subr.bf16.mxu0 %v461_v26 }
  0x49   :  { %492 = vmatpush3.bf16.msra.mxu1 %v489_v29 }
  0x4a   :  { %464 = vmatpush3.bf16.msra.mxu0 %v461_v26  ;;  %494 = vmatprep.subr.bf16.mxu1 %v493_v35 }
  0x4b   :  { %466 = vmatprep.subr.bf16.mxu0 %v465_v32 }
  0x4d   :  { %496 = vmatpush3.bf16.msra.mxu1 %v493_v35 }
  0x4e   :  { %468 = vmatpush3.bf16.msra.mxu0 %v465_v32  ;;  %498 = vmatprep.subr.bf16.mxu1 %v497_v41 }
  0x4f   :  { %470 = vmatprep.subr.bf16.mxu0 %v469_v38 }
  0x51   :  { %500 = vmatpush3.bf16.msra.mxu1 %v497_v41 }
  0x52   :  { %472 = vmatpush3.bf16.msra.mxu0 %v469_v38  ;;  %502 = vmatprep.subr.bf16.mxu1 %v501_v45 }
  0x53   :  { %474 = vmatprep.subr.bf16.mxu0 %v473_v44 }
  0x55   :  { %504 = vmatpush3.bf16.msra.mxu1 %v501_v45 }
  0x56   :  { %476 = vmatpush3.bf16.msra.mxu0 %v473_v44  ;;  %506 = vmatprep.subr.bf16.mxu1 %v505_v49 }
  0x59   :  { %408 = vmatmul.mubr.f32.vlgmr.msra.gmra.mrb[0].mxu0 %v69_v46  ;;  %508 = vmatpush3.bf16.msra.mxu1 %v505_v49 }
 0x12c   :  { %v409_v51 = vpop.f32.mrb[0].mxu0 }
 0x12d   :  { %v165_v52 = vadd.f32 %v409_v51, %v335_v50  ;;  %v159_v53 = vpop.f32.mrb[1].mxu0 }
 0x12e   :  { %v160_v54 = vadd.f32 %v335_v50, %v159_v53 }
 0x12f   :  { %v169_v56 = vmax.f32 %v165_v52, 0.0 }
 0x130   :  { %v168_v55 = vmax.f32 %v160_v54, 0.0 }
 0x132   :  { %442 = vmatprep.mubr.f32.mxu1 %v168_v55 }
 0x133   :  { %443 = vmatmul.mubr.f32.vlgmr.msra.gmra.mrb[0].mxu1 %v169_v56 }
 0x206   :  { %v444_v58 = vpop.f32.mrb[0].mxu1 }
 0x207   :  { %v259_v59 = vpop.f32.mrb[1].mxu1  ;;  %v265_v61 = vadd.f32 %v444_v58, %v336_v57 }
 0x208   :  { %v260_v60 = vadd.f32 %v336_v57, %v259_v59 }
 0x209   :  { %v269_v63 = vadd.f32 %v265_v61, %v69_v46 }
 0x20a   :  { %v268_v62 = vadd.f32 %v260_v60, %v711_v11 }
 0x20c   :  { %272 = vadd.xlane.f32.xlu0 %v268_v62 }
 0x210   :  { %274 = vadd.xlane.f32.xlu0 %v269_v63 }
 0x299   :  { %v273_v2 = vpop.xlane.xlu0 %272 }
 0x29a   :  { %v276_v3 = vmul.f32 0.03125, %v273_v2 }
 0x29c   :  { %v278_v4 = vsub.f32 %v268_v62, %v276_v3 }
 0x29d   :  { %v275_v5 = vpop.xlane.xlu0 %274 }
 0x29e   :  { %v277_v6 = vmul.f32 0.03125, %v275_v5  ;;  %v283_v7 = vsel %vm282_vm0, %v278_v4, 0.0 }
 0x29f   :  { %v285_v8 = vmul.f32 %v283_v7, %v283_v7 }
 0x2a0   :  { %v279_v9 = vsub.f32 %v269_v63, %v277_v6 }
 0x2a1   :  { %287 = vadd.xlane.f32.xlu1 %v285_v8 }
 0x2a2   :  { %v284_v10 = vsel %vm282_vm0, %v279_v9, 0.0 }
 0x2a3   :  { %v286_v12 = vmul.f32 %v284_v10, %v284_v10 }
 0x2a5   :  { %289 = vadd.xlane.f32.xlu1 %v286_v12 }
 0x32e   :  { %v288_v13 = vpop.xlane.xlu1 %287 }
 0x32f   :  { %v291_v11 = vmul.f32 0.03125, %v288_v13 }
 0x331   :  { %v293_v14 = vadd.f32 1e-06, %v291_v11 }
 0x332   :  { %v290_v15 = vpop.xlane.xlu1 %289 }
 0x333   :  { %515 = vrsqrt.f32 %v293_v14  ;;  %v292_v16 = vmul.f32 0.03125, %v290_v15 }
 0x335   :  { %v294_v17 = vadd.f32 1e-06, %v292_v16 }
 0x337   :  { %517 = vrsqrt.f32 %v294_v17 }
 0x33d   :  { %v516_v18 = vpop.eup %515 }
 0x33e   :  { %v297_v20 = vmul.f32 %v516_v18, %v278_v4 }
 0x340   :  { %v305_v22 = vmul.f32 %v337_v19, %v297_v20 }
 0x341   :  { %v518_v23 = vpop.eup %517 }
 0x342   :  { %v298_v24 = vmul.f32 %v518_v23, %v279_v9  ;;  %v313_v25 = vadd.f32 %v338_v21, %v305_v22 }
 0x344   :  { %v306_v26 = vmul.f32 %v337_v19, %v298_v24  ;;  %315 = vst [vmem:[#allocation8] sm:$0xff] %v313_v25 }
 0x346   :  { %v314_v27 = vadd.f32 %v338_v21, %v306_v26 }
 0x348   :  { %316 = vst [vmem:[#allocation8 + $0x8] sm:$0xff] %v314_v27 }
 0x349   :  { %596 = shalt.err (!%p593_p0)
}
 0x34a   :  { %s597_s24 = scalar_lea.hbm %s749_s7, 256 }
 0x34b   :  { %p598_p1 = scmp.ne.s32.totalorder %s749_s7, %s597_s24  ;;  %p601_p2 = scmp.lt.u32.totalorder %s597_s24, %s749_s7 }
 0x34d   :  { %p603_p3 = pnand %p601_p2, %p598_p1 }
 0x34f   :  { %606 = shalt.err (!%p603_p3)
}
 0x350   :  { %328 = dma.vmem_to_hbm [thread:$0]  %s323_s22, 256, %s749_s7, [#allocation4], %s615_s13, %s615_s13, %s616_s14  }
 0x351   :  { %611 = dma.done.wait [#allocation4], 256  }
 0x352   :  { %612 = vsyncadd [#allocation4], 4294967040 }
 0x353   :  { %332 = vsyncpa [#allocation3], 1 }
 0x354   :  { %333 = vsyncpa [#allocation6], 1 }
 0x355   :  { %334 = vsyncpa [#allocation4], 1 }

</bundles_post_ra>
